<compile_context>
chip_gen: v5e
topology: v5e:2x2
jax: 0.10.0
libtpu: 0.0.40
codegen_flags: <defaults>
</compile_context>

<pallas_src>
import functools

import jax
import jax.numpy as jnp
from jax import lax
from jax.experimental import pallas as pl
from jax.experimental.pallas import tpu as pltpu

_IGNORE_INDEX = -100


def _focal_loss_kernel(x_ref, t_ref, o_ref, *, gamma: float, n_total: int):
    i = pl.program_id(0)
    block_rows = x_ref.shape[0]

    x = x_ref[...].astype(jnp.float32)                        # (tm, C)
    t = t_ref[...]                                            # (tm, 1) int32

    # Numerically-stable log-sum-exp along the class (lane) axis.
    m = jnp.max(x, axis=-1, keepdims=True)                    # (tm, 1)
    shifted = x - m                                           # (tm, C)
    lse = jnp.log(jnp.sum(jnp.exp(shifted), axis=-1, keepdims=True))  # (tm, 1)

    # Gather the shifted target logit via a one-hot lane-reduce (stays on the
    # VPU/XLU; no data-dependent gather, no full-tile focal math).
    cols = lax.broadcasted_iota(jnp.int32, x.shape, 1)        # (tm, C)
    onehot = (cols == t).astype(jnp.float32)
    xs_t = jnp.sum(onehot * shifted, axis=-1, keepdims=True)  # (tm, 1) = x_t - m

    # Per-row focal NLL computed on (tm, 1) only.
    logp_t = xs_t - lse                                       # (tm, 1)
    p_t = jnp.exp(logp_t)
    omp = jnp.maximum(1.0 - p_t, 0.0)

    g = float(gamma)
    if g == int(g) and 0 <= int(g) <= 8:
        # Small integer gamma: repeated multiply (no EUP log/exp round-trip).
        fw = jnp.ones_like(omp)
        for _ in range(int(g)):
            fw = fw * omp
    else:
        fw = jnp.power(omp, jnp.float32(g))
    per_row = -(fw * logp_t)                                  # (tm, 1)

    # Mask out padding rows and ignored targets.
    rows = i * block_rows + lax.broadcasted_iota(
        jnp.int32, (block_rows, 1), 0)
    valid = jnp.logical_and(rows < n_total,
                            t != _IGNORE_INDEX).astype(jnp.float32)
    o_ref[...] = per_row * valid


def _pick_block_rows(n: int, c: int, itemsize: int,
                     budget_bytes: int = 8 << 20) -> int:
    """Largest row tile keeping the double-buffered logits tiles in budget."""
    br = budget_bytes // max(1, 2 * c * itemsize)
    br = int(max(8, min(1024, (br // 8) * 8)))
    # Do not tile larger than the (8-row padded) problem itself.
    br = min(br, max(8, ((n + 7) // 8) * 8))
    return br


def focal_loss(logits: jax.Array, targets: jax.Array,
               gamma: float = 2.0, block_rows: int | None = None) -> jax.Array:
    """FocalLoss(weight=None, gamma, reduction='mean') forward pass."""
    n, c = logits.shape
    itemsize = jnp.dtype(logits.dtype).itemsize
    if block_rows is None:
        block_rows = _pick_block_rows(n, c, itemsize)

    t2d = targets.astype(jnp.int32).reshape(n, 1)

    # Pad rows so the grid covers N exactly; padded rows are masked in-kernel.
    n_pad = pl.cdiv(n, block_rows) * block_rows
    if n_pad != n:
        logits = jnp.pad(logits, ((0, n_pad - n), (0, 0)))
        t2d = jnp.pad(t2d, ((0, n_pad - n), (0, 0)))

    kernel = functools.partial(_focal_loss_kernel, gamma=gamma, n_total=n)

    per_row = pl.pallas_call(
        kernel,
        out_shape=jax.ShapeDtypeStruct((n_pad, 1), jnp.float32),
        grid_spec=pltpu.PrefetchScalarGridSpec(
            num_scalar_prefetch=0,
            grid=(n_pad // block_rows,),
            in_specs=[
                pl.BlockSpec((block_rows, c), lambda i: (i, 0)),
                pl.BlockSpec((block_rows, 1), lambda i: (i, 0)),
            ],
            out_specs=pl.BlockSpec((block_rows, 1), lambda i: (i, 0)),
        ),
        compiler_params=pltpu.CompilerParams(
            dimension_semantics=("parallel",)),
    )(logits, t2d)

    # 'mean' reduction over non-ignored targets (PyTorch nll_loss semantics).
    denom = jnp.sum((targets != _IGNORE_INDEX).astype(jnp.float32))
    return jnp.sum(per_row) / denom


def _focal_loss_ref(logits, targets, gamma=2.0):
    """Pure-JAX reference mirroring the PyTorch module (ignore_index=-100)."""
    t = targets.astype(jnp.int32)
    log_prob = jax.nn.log_softmax(logits.astype(jnp.float32), axis=-1)
    prob = jnp.exp(log_prob)
    focal = (1.0 - prob) ** gamma * log_prob
    safe_t = jnp.where(t == _IGNORE_INDEX, 0, t)
    picked = jnp.take_along_axis(focal, safe_t[:, None], axis=-1)[:, 0]
    valid = (t != _IGNORE_INDEX).astype(jnp.float32)
    return jnp.sum(-picked * valid) / jnp.sum(valid)


if __name__ == "__main__":
    key = jax.random.PRNGKey(0)

    # Case 1: aligned shapes, gamma = 2 (fast integer-power path).
    k1, k2, key = jax.random.split(key, 3)
    N, C = 16, 128
    logits = jax.random.normal(k1, (N, C), dtype=jnp.float32)
    targets = jax.random.randint(k2, (N,), 0, C, dtype=jnp.int32)
    loss = jax.block_until_ready(focal_loss(logits, targets, gamma=2.0))
    ref = _focal_loss_ref(logits, targets, gamma=2.0)
    assert jnp.allclose(loss, ref, rtol=1e-5, atol=1e-5), (loss, ref)

    # Case 2: N not a multiple of 8, odd C (padding + masking path).
    k1, k2, key = jax.random.split(key, 3)
    N, C = 37, 96
    logits = jax.random.normal(k1, (N, C), dtype=jnp.float32)
    targets = jax.random.randint(k2, (N,), 0, C, dtype=jnp.int32)
    loss = jax.block_until_ready(focal_loss(logits, targets, gamma=2.0))
    ref = _focal_loss_ref(logits, targets, gamma=2.0)
    assert jnp.allclose(loss, ref, rtol=1e-5, atol=1e-5), (loss, ref)

    # Case 3: non-integer gamma (jnp.power path on the gathered (tm,1) values).
    loss = jax.block_until_ready(focal_loss(logits, targets, gamma=1.5))
    ref = _focal_loss_ref(logits, targets, gamma=1.5)
    assert jnp.allclose(loss, ref, rtol=1e-5, atol=1e-5), (loss, ref)

    # Case 4: multiple grid steps + ignore_index rows + bf16 logits.
    k1, k2, key = jax.random.split(key, 3)
    N, C = 530, 160
    logits = jax.random.normal(k1, (N, C), dtype=jnp.float32)
    targets = jax.random.randint(k2, (N,), 0, C, dtype=jnp.int32)
    targets = targets.at[::7].set(_IGNORE_INDEX)
    loss = jax.block_until_ready(
        focal_loss(logits.astype(jnp.bfloat16), targets, gamma=2.0,
                   block_rows=128))
    ref = _focal_loss_ref(logits.astype(jnp.bfloat16).astype(jnp.float32),
                          targets, gamma=2.0)
    assert jnp.allclose(loss, ref, rtol=1e-4, atol=1e-4), (loss, ref)

    print("KERNEL_OK")
</pallas_src>

<mosaic_0001>
module attributes {stable_mosaic.version = 11 : i64} {
  func.func @_focal_loss_kernel(%arg0: i32, %arg1: memref<16x128xf32, #tpu.memory_space<vmem>>, %arg2: memref<16x1xi32, #tpu.memory_space<vmem>>, %arg3: memref<16x1xf32, #tpu.memory_space<vmem>>) attributes {dimension_semantics = [#tpu.dimension_semantics<parallel>], iteration_bounds = array<i64: 1>, scalar_prefetch = 0 : i64, scratch_operands = 0 : i64, tpu.core_type = #tpu.core_type<tc>, window_params = [{transform_indices = @transform_0, window_bounds = array<i64: 16, 128>}, {transform_indices = @transform_1, window_bounds = array<i64: 16, 1>}, {transform_indices = @transform_2, window_bounds = array<i64: 16, 1>}]} {
    %c0 = arith.constant 0 : index
    %c0_0 = arith.constant 0 : index
    %0 = vector.load %arg1[%c0, %c0_0] : memref<16x128xf32, #tpu.memory_space<vmem>>, vector<16x128xf32>
    %c0_1 = arith.constant 0 : index
    %c0_2 = arith.constant 0 : index
    %1 = vector.load %arg2[%c0_1, %c0_2] : memref<16x1xi32, #tpu.memory_space<vmem>>, vector<16x1xi32>
    %cst = arith.constant dense<0xFF800000> : vector<16xf32>
    %2 = vector.multi_reduction <maximumf>, %0, %cst [1] : vector<16x128xf32> to vector<16xf32>
    %3 = vector.shape_cast %2 : vector<16xf32> to vector<16x1xf32>
    %4 = vector.broadcast %3 : vector<16x1xf32> to vector<16x128xf32>
    %5 = arith.subf %0, %4 : vector<16x128xf32>
    %6 = math.exp %5 : vector<16x128xf32>
    %cst_3 = arith.constant dense<0.000000e+00> : vector<16xf32>
    %7 = vector.multi_reduction <add>, %6, %cst_3 [1] : vector<16x128xf32> to vector<16xf32>
    %8 = vector.shape_cast %7 : vector<16xf32> to vector<16x1xf32>
    %9 = math.log %8 : vector<16x1xf32>
    %10 = tpu.iota {dimensions = array<i32: 1>} : vector<16x128xi32>
    %11 = vector.broadcast %1 : vector<16x1xi32> to vector<16x128xi32>
    %12 = arith.cmpi eq, %10, %11 : vector<16x128xi32>
    %13 = arith.extui %12 : vector<16x128xi1> to vector<16x128xi32>
    %14 = arith.sitofp %13 : vector<16x128xi32> to vector<16x128xf32>
    %15 = arith.mulf %14, %5 : vector<16x128xf32>
    %cst_4 = arith.constant dense<0.000000e+00> : vector<16xf32>
    %16 = vector.multi_reduction <add>, %15, %cst_4 [1] : vector<16x128xf32> to vector<16xf32>
    %17 = vector.shape_cast %16 : vector<16xf32> to vector<16x1xf32>
    %18 = arith.subf %17, %9 : vector<16x1xf32>
    %19 = math.exp %18 : vector<16x1xf32>
    %cst_5 = arith.constant 1.000000e+00 : f32
    %20 = vector.broadcast %cst_5 : f32 to vector<16x1xf32>
    %21 = arith.subf %20, %19 : vector<16x1xf32>
    %cst_6 = arith.constant 0.000000e+00 : f32
    %22 = vector.broadcast %cst_6 : f32 to vector<16x1xf32>
    %23 = arith.maximumf %21, %22 : vector<16x1xf32>
    %cst_7 = arith.constant 1.000000e+00 : f32
    %24 = vector.broadcast %cst_7 : f32 to vector<16x1xf32>
    %25 = arith.mulf %24, %23 : vector<16x1xf32>
    %26 = arith.mulf %25, %23 : vector<16x1xf32>
    %27 = arith.mulf %26, %18 : vector<16x1xf32>
    %cst_8 = arith.constant 0.000000e+00 : f32
    %28 = vector.broadcast %cst_8 : f32 to vector<16x1xf32>
    %29 = arith.subf %28, %27 : vector<16x1xf32>
    %c16_i32 = arith.constant 16 : i32
    %30 = arith.muli %arg0, %c16_i32 : i32
    %31 = tpu.iota {dimensions = array<i32: 0>} : vector<16x1xi32>
    %32 = vector.broadcast %30 : i32 to vector<16x1xi32>
    %33 = arith.addi %32, %31 : vector<16x1xi32>
    %c16_i32_9 = arith.constant 16 : i32
    %34 = vector.broadcast %c16_i32_9 : i32 to vector<16x1xi32>
    %35 = arith.cmpi slt, %33, %34 : vector<16x1xi32>
    %c-100_i32 = arith.constant -100 : i32
    %36 = vector.broadcast %c-100_i32 : i32 to vector<16x1xi32>
    %37 = arith.cmpi ne, %1, %36 : vector<16x1xi32>
    %38 = arith.andi %35, %37 : vector<16x1xi1>
    %39 = arith.extui %38 : vector<16x1xi1> to vector<16x1xi32>
    %40 = arith.sitofp %39 : vector<16x1xi32> to vector<16x1xf32>
    %41 = arith.mulf %29, %40 : vector<16x1xf32>
    %c0_10 = arith.constant 0 : index
    %c0_11 = arith.constant 0 : index
    %42 = vector.load %arg3[%c0_10, %c0_11] : memref<16x1xf32, #tpu.memory_space<vmem>>, vector<16x1xf32>
    tpu.vector_store %arg3[%c0_10, %c0_11], %41 {strides = array<i32>} : memref<16x1xf32, #tpu.memory_space<vmem>>, vector<16x1xf32>,
    return
  }
  func.func @transform_0(%arg0: i32) -> (i32, i32) {
    %c0_i32 = arith.constant 0 : i32
    %c0_i32_0 = arith.constant 0 : i32
    return %arg0, %c0_i32 : i32, i32
  }
  func.func @transform_1(%arg0: i32) -> (i32, i32) {
    %c0_i32 = arith.constant 0 : i32
    %c0_i32_0 = arith.constant 0 : i32
    return %arg0, %c0_i32 : i32, i32
  }
  func.func @transform_2(%arg0: i32) -> (i32, i32) {
    %c0_i32 = arith.constant 0 : i32
    %c0_i32_0 = arith.constant 0 : i32
    return %arg0, %c0_i32 : i32, i32
  }
}

</mosaic_0001>

<bundles_post_ra>
// kernel: tpu_custom_call.1
= control target key start
LH: loop header
LB: loop body
LE: loop exit
PB: predicated region body
PF: predicated region fallthrough
CT: control target
= control target key end

     0   :  { %v115_v0 = vmov 0   ;;  %v33_v5 = vlaneseq  ;;  %v116_v9 = vmov 0.0   ;;  %vm88_vm3 = vcmask 7168   ;;  %s154_s0 = inlined_call_operand.vmem [shape: f32[16,128], index: 0, kind: input, shape index: {}]   ;;  %s155_s1 = inlined_call_operand.vmem [shape: s32[16,1], index: 1, kind: input, shape index: {}]   ;;  %s156_s2 = inlined_call_operand.vmem [shape: f32[16,1], index: 2, kind: output, shape index: {}]  }
   0x1   :  { %101 = vset.pattern.permute.xlu1 %v115_v0  ;;  %v11_v1 = vld [vmem:[%s154_s0] sm:$0xff]  ;;  %102 = vset.pattern.permute.xlu0 %v115_v0  ;;  %v12_v3 = vld [vmem:[%s154_s0 + $0x8] sm:$0xff] }
   0x2   :  { %v13_v2 = vld [vmem:[%s155_s1] sm:$0xff]  ;;  %15 = vmax.xlane.f32.xlu0 %v11_v1  ;;  %v144_v4 = vld [vmem:[%s155_s1 + $0x8] sm:$0xff]  ;;  %v34_v6 = vand.u32 127, %v33_v5 }
   0x3   :  { %36 = vperm.xlu1 %101, %v13_v2   ;;  %vm78_vm2 = vcmp.ne.s32.totalorder %v13_v2, 4294967196  ;;  %vm79_vm4 = vcmp.ne.s32.totalorder %v144_v4, 4294967196 }
   0x4   :  { %v97_v40 = vsel %vm78_vm2, 1.0, %v116_v9  ;;  %v98_v47 = vsel %vm79_vm4, 1.0, %v116_v9 }
   0xa   :  { %17 = vmax.xlane.f32.xlu0 %v12_v3 }
   0xb   :  { %39 = vperm.xlu1 %101, %v144_v4  }
  0x75   :  { %v37_v7 = vpop.permute.xlu1 %36  ;;  %v16_v8 = vpop.xlane.xlu0 %15 }
  0x76   :  { %vm41_vm0 = vcmp.eq.s32.totalorder %v34_v6, %v37_v7  ;;  %v19_v11 = vsub.f32 %v11_v1, %v16_v8 }
  0x77   :  { %v95_v10 = vsel %vm41_vm0, 1.0, %v116_v9 }
  0x78   :  { %v47_v12 = vmul.f32 %v95_v10, %v19_v11  ;;  %v21_v13 = vmul.f32 1.442695, %v19_v11 }
  0x7a   :  { %49 = vadd.xlane.f32.xlu0 %v47_v12  ;;  %103 = vpow2.f32 %v21_v13 }
  0x7d   :  { %v40_v14 = vpop.permute.xlu1 %39  ;;  %v18_v15 = vpop.xlane.xlu0 %17 }
  0x7e   :  { %vm42_vm1 = vcmp.eq.s32.totalorder %v34_v6, %v40_v14  ;;  %v20_v17 = vsub.f32 %v12_v3, %v18_v15 }
  0x7f   :  { %v96_v16 = vsel %vm42_vm1, 1.0, %v116_v9 }
  0x80   :  { %v104_v18 = vpop.eup %103  ;;  %v23_v19 = vmul.f32 1.442695, %v20_v17  ;;  %v48_v20 = vmul.f32 %v96_v16, %v20_v17 }
  0x81   :  { %25 = vadd.xlane.f32.xlu2 %v104_v18 }
  0x82   :  { %105 = vpow2.f32 %v23_v19  ;;  %51 = vadd.xlane.f32.xlu1 %v48_v20 }
  0x88   :  { %v106_v21 = vpop.eup %105 }
  0x89   :  { %27 = vadd.xlane.f32.xlu2 %v106_v21 }
  0xed   :  { %v50_v26 = vpop.xlane.xlu0 %49 }
  0xf4   :  { %v26_v22 = vpop.xlane.xlu2 %25 }
  0xf5   :  { %107 = vlog2.f32 %v26_v22  ;;  %v52_v31 = vpop.xlane.xlu1 %51 }
  0xfb   :  { %v108_v23 = vpop.eup %107 }
  0xfc   :  { %v30_v24 = vmul.f32 0.6931472, %v108_v23  ;;  %v28_v25 = vpop.xlane.xlu2 %27 }
  0xfd   :  { %109 = vlog2.f32 %v28_v25 }
  0xfe   :  { %v53_v27 = vsub.f32 %v50_v26, %v30_v24 }
 0x100   :  { %v55_v28 = vmul.f32 1.442695, %v53_v27 }
 0x102   :  { %111 = vpow2.f32 %v55_v28 }
 0x103   :  { %v110_v29 = vpop.eup %109 }
 0x104   :  { %v32_v30 = vmul.f32 0.6931472, %v110_v29 }
 0x106   :  { %v54_v32 = vsub.f32 %v52_v31, %v32_v30 }
 0x108   :  { %v112_v33 = vpop.eup %111  ;;  %v57_v34 = vmul.f32 1.442695, %v54_v32 }
 0x109   :  { %v59_v35 = vsub.f32 1.0, %v112_v33 }
 0x10a   :  { %113 = vpow2.f32 %v57_v34 }
 0x10b   :  { %v61_v36 = vmax.f32 %v59_v35, 0.0 }
 0x10d   :  { %v63_v37 = vmul.f32 %v61_v36, %v61_v36 }
 0x10f   :  { %v65_v38 = vmul.f32 %v63_v37, %v53_v27 }
 0x110   :  { %v114_v39 = vpop.eup %113 }
 0x111   :  { %v67_v41 = vsub.f32 0.0, %v65_v38  ;;  %v60_v42 = vsub.f32 1.0, %v114_v39 }
 0x113   :  { %v86_v43 = vmul.f32 %v97_v40, %v67_v41  ;;  %v62_v44 = vmax.f32 %v60_v42, 0.0 }
 0x115   :  { %89 = vst.msk [vmem:[%s156_s2] sm:$0xff] %vm88_vm3, %v86_v43  ;;  %v64_v45 = vmul.f32 %v62_v44, %v62_v44 }
 0x117   :  { %v66_v46 = vmul.f32 %v64_v45, %v54_v32 }
 0x119   :  { %v68_v48 = vsub.f32 0.0, %v66_v46 }
 0x11b   :  { %v87_v49 = vmul.f32 %v98_v47, %v68_v48 }
 0x11d   :  { %90 = vst.msk [vmem:[%s156_s2 + $0x8] sm:$0xff] %vm88_vm3, %v87_v49 }

</bundles_post_ra>
